<compile_context>
chip_gen: v5e
topology: v5e:2x2
jax: 0.10.0
libtpu: 0.0.40
codegen_flags: <defaults>
</compile_context>

<pallas_src>
import math

import jax
import jax.numpy as jnp
from jax import lax
from jax.experimental import pallas as pl
from jax.experimental.pallas import tpu as pltpu


def _gelu_exact(x):
    # torch.nn.GELU() default is the exact (erf-based) GELU; computed in f32
    # on the accumulator tile.
    return 0.5 * x * (1.0 + lax.erf(x * jnp.float32(1.0 / math.sqrt(2.0))))


def ffn_kernel(x_ref, w1_ref, b1_ref, w2_ref, b2_ref, o_ref, acc_ref):
    # Grid: (token tiles, d_ff tiles). Axis 1 is the reduction over d_ff.
    # x_ref:  (tm, d_model)      token tile (resident across k)
    # w1_ref: (d_model, tf)      W1 slab for this d_ff tile
    # b1_ref: (1, tf)            b1 slab for this d_ff tile
    # w2_ref: (tf, d_model)      W2 slab for this d_ff tile
    # b2_ref: (1, d_model)       full b2 (resident)
    # acc_ref: (tm, d_model) f32 accumulator scratch
    k = pl.program_id(1)

    # Initialize the output accumulator with the second-layer bias.
    @pl.when(k == 0)
    def _():
        acc_ref[...] = jnp.broadcast_to(
            b2_ref[...].astype(jnp.float32), acc_ref.shape)

    # Linear1 partial: native-dtype operands straight to the MXU, f32 accum.
    h = jnp.dot(x_ref[...], w1_ref[...], preferred_element_type=jnp.float32)
    h = h + b1_ref[...].astype(jnp.float32)
    h = _gelu_exact(h)

    # Linear2 partial, accumulated into the resident (tm, d_model) tile.
    acc_ref[...] += jnp.dot(h.astype(w2_ref.dtype), w2_ref[...],
                            preferred_element_type=jnp.float32)

    @pl.when(k == pl.num_programs(1) - 1)
    def _():
        o_ref[...] = acc_ref[...].astype(o_ref.dtype)


def _pick_tile(total, target, align):
    """Largest t <= target with t % align == 0 and total % t == 0, else total."""
    if total <= target:
        return total
    t = (min(target, total) // align) * align
    while t >= align:
        if total % t == 0:
            return t
        t -= align
    return total


def feed_forward(x, w1, b1, w2, b2, *, tm=None, tf=None):
    """x: (B, S, d_model); w1: (d_model, d_ff); w2: (d_ff, d_model)."""
    B, S, d_model = x.shape
    d_ff = w1.shape[1]
    n_tok = B * S

    # Tile targets: tm≈512 keeps the MXU busy on v6e/v7x (still fine on v5e
    # at these sizes); tf≈2048 bounds per-step weight traffic / VMEM.
    # TODO(synk): for very large d_ff on v7x (64 MiB VMEM) prefer tf≈1024.
    if tm is None:
        tm = _pick_tile(n_tok, 512, 8)
    if tf is None:
        tf = _pick_tile(d_ff, 2048, 128)
    assert n_tok % tm == 0 and d_ff % tf == 0

    x2d = x.reshape(n_tok, d_model)
    b1_2d = b1.reshape(1, d_ff)
    b2_2d = b2.reshape(1, d_model)

    grid = (n_tok // tm, d_ff // tf)

    itemsize = jnp.dtype(x.dtype).itemsize
    cost = pl.CostEstimate(
        flops=2 * 2 * n_tok * d_model * d_ff,          # two matmuls
        transcendentals=n_tok * d_ff,                  # erf per hidden element
        bytes_accessed=(x2d.size + w1.size + w2.size + b1.size + b2.size
                        + n_tok * d_model) * itemsize,
    )

    # Per-step VMEM footprint estimate (double-buffered inputs/output + f32
    # accumulator), with headroom, clamped to be valid on every generation
    # (v7x has only 64 MiB physical VMEM per TensorCore).
    step_bytes = (2 * (tm * d_model + d_model * tf + tf + tf * d_model + d_model)
                  * itemsize
                  + 2 * tm * d_model * itemsize
                  + tm * d_model * 4)
    vmem_limit = int(min(64 * 1024 * 1024,
                         max(32 * 1024 * 1024, 2 * step_bytes)))

    out = pl.pallas_call(
        ffn_kernel,
        out_shape=jax.ShapeDtypeStruct((n_tok, d_model), x.dtype),
        grid_spec=pltpu.PrefetchScalarGridSpec(
            num_scalar_prefetch=0,
            grid=grid,
            in_specs=[
                pl.BlockSpec((tm, d_model), lambda i, k: (i, 0)),   # x tile
                pl.BlockSpec((d_model, tf), lambda i, k: (0, k)),   # W1 slab
                pl.BlockSpec((1, tf), lambda i, k: (0, k)),         # b1 slab
                pl.BlockSpec((tf, d_model), lambda i, k: (k, 0)),   # W2 slab
                pl.BlockSpec((1, d_model), lambda i, k: (0, 0)),    # b2 (resident)
            ],
            out_specs=pl.BlockSpec((tm, d_model), lambda i, k: (i, 0)),
            scratch_shapes=[pltpu.VMEM((tm, d_model), jnp.float32)],
        ),
        compiler_params=pltpu.CompilerParams(
            dimension_semantics=("parallel", "arbitrary"),
            vmem_limit_bytes=vmem_limit),
        cost_estimate=cost,
    )(x2d, w1, b1_2d, w2, b2_2d)

    return out.reshape(B, S, d_model)


def init_params(key, d_model, d_ff, dtype=jnp.float32):
    """Xavier-normal weights (gain=1.0), zero biases — matches init_weights()."""
    k1, k2 = jax.random.split(key)
    std1 = math.sqrt(2.0 / (d_model + d_ff))
    std2 = math.sqrt(2.0 / (d_ff + d_model))
    # Stored as (in_features, out_features) so the kernel computes x @ W.
    w1 = (jax.random.normal(k1, (d_model, d_ff), jnp.float32) * std1).astype(dtype)
    w2 = (jax.random.normal(k2, (d_ff, d_model), jnp.float32) * std2).astype(dtype)
    b1 = jnp.zeros((d_ff,), dtype)
    b2 = jnp.zeros((d_model,), dtype)
    return w1, b1, w2, b2


def feed_forward_ref(x, w1, b1, w2, b2):
    h = jnp.dot(x, w1) + b1
    h = 0.5 * h * (1.0 + lax.erf(h / jnp.sqrt(2.0)))
    return jnp.dot(h, w2) + b2


if __name__ == "__main__":
    batch, seq, d_model, d_ff = 2, 8, 32, 64

    key = jax.random.PRNGKey(0)
    kx, kp = jax.random.split(key)
    x = jax.random.normal(kx, (batch, seq, d_model), jnp.float32)
    w1, b1, w2, b2 = init_params(kp, d_model, d_ff)

    y = feed_forward(x, w1, b1, w2, b2)
    y = jax.block_until_ready(y)

    y_ref = feed_forward_ref(x, w1, b1, w2, b2)
    assert y.shape == (batch, seq, d_model)
    assert jnp.allclose(y, y_ref, atol=1e-5, rtol=1e-5), "mismatch vs reference"

    print("KERNEL_OK")
</pallas_src>

<mosaic_0001>
module attributes {stable_mosaic.version = 11 : i64} {
  func.func @ffn_kernel(%arg0: i32, %arg1: i32, %arg2: memref<16x32xf32, #tpu.memory_space<vmem>>, %arg3: memref<32x64xf32, #tpu.memory_space<vmem>>, %arg4: memref<1x64xf32, #tpu.memory_space<vmem>>, %arg5: memref<64x32xf32, #tpu.memory_space<vmem>>, %arg6: memref<1x32xf32, #tpu.memory_space<vmem>>, %arg7: memref<16x32xf32, #tpu.memory_space<vmem>>, %arg8: memref<16x32xf32, #tpu.memory_space<vmem>>) attributes {dimension_semantics = [#tpu.dimension_semantics<parallel>, #tpu.dimension_semantics<arbitrary>], iteration_bounds = array<i64: 1, 1>, scalar_prefetch = 0 : i64, scratch_operands = 1 : i64, tpu.core_type = #tpu.core_type<tc>, window_params = [{transform_indices = @transform_0, window_bounds = array<i64: 16, 32>}, {transform_indices = @transform_1, window_bounds = array<i64: 32, 64>}, {transform_indices = @transform_2, window_bounds = array<i64: 1, 64>}, {transform_indices = @transform_3, window_bounds = array<i64: 64, 32>}, {pipeline_mode = #tpu.pipeline_mode<synchronous>, transform_indices = @transform_4, window_bounds = array<i64: 1, 32>}, {transform_indices = @transform_5, window_bounds = array<i64: 16, 32>}]} {
    %c0_i32 = arith.constant 0 : i32
    %0 = arith.cmpi eq, %arg1, %c0_i32 : i32
    %1 = arith.extui %0 : i1 to i32
    %c0_i32_0 = arith.constant 0 : i32
    %2 = arith.cmpi ne, %1, %c0_i32_0 : i32
    scf.if %2 {
      %c0_18 = arith.constant 0 : index
      %c0_19 = arith.constant 0 : index
      %25 = vector.load %arg6[%c0_18, %c0_19] : memref<1x32xf32, #tpu.memory_space<vmem>>, vector<1x32xf32>
      %26 = vector.shape_cast %25 : vector<1x32xf32> to vector<1x32xf32>
      %27 = vector.broadcast %26 : vector<1x32xf32> to vector<16x32xf32>
      %c0_20 = arith.constant 0 : index
      %c0_21 = arith.constant 0 : index
      %28 = vector.load %arg8[%c0_20, %c0_21] : memref<16x32xf32, #tpu.memory_space<vmem>>, vector<16x32xf32>
      tpu.vector_store %arg8[%c0_20, %c0_21], %27 {strides = array<i32>} : memref<16x32xf32, #tpu.memory_space<vmem>>, vector<16x32xf32>,
    } else {
    }
    %c0 = arith.constant 0 : index
    %c0_1 = arith.constant 0 : index
    %3 = vector.load %arg2[%c0, %c0_1] : memref<16x32xf32, #tpu.memory_space<vmem>>, vector<16x32xf32>
    %c0_2 = arith.constant 0 : index
    %c0_3 = arith.constant 0 : index
    %4 = vector.load %arg3[%c0_2, %c0_3] : memref<32x64xf32, #tpu.memory_space<vmem>>, vector<32x64xf32>
    %cst = arith.constant dense<0.000000e+00> : vector<16x64xf32>
    %5 = tpu.matmul %3, %4, %cst {dimension_numbers = #tpu.dot_dimension_numbers<[1], [0], [0], [1], [0, 0, 1, 1], [], []>} : vector<16x32xf32>, vector<32x64xf32>, vector<16x64xf32> -> vector<16x64xf32>
    %c0_4 = arith.constant 0 : index
    %c0_5 = arith.constant 0 : index
    %6 = vector.load %arg4[%c0_4, %c0_5] : memref<1x64xf32, #tpu.memory_space<vmem>>, vector<1x64xf32>
    %7 = vector.broadcast %6 : vector<1x64xf32> to vector<16x64xf32>
    %8 = arith.addf %5, %7 : vector<16x64xf32>
    %cst_6 = arith.constant 5.000000e-01 : f32
    %9 = vector.broadcast %cst_6 : f32 to vector<16x64xf32>
    %10 = arith.mulf %9, %8 : vector<16x64xf32>
    %cst_7 = arith.constant 0.707106769 : f32
    %11 = vector.broadcast %cst_7 : f32 to vector<16x64xf32>
    %12 = arith.mulf %8, %11 : vector<16x64xf32>
    %13 = math.erf %12 : vector<16x64xf32>
    %cst_8 = arith.constant 1.000000e+00 : f32
    %14 = vector.broadcast %cst_8 : f32 to vector<16x64xf32>
    %15 = arith.addf %14, %13 : vector<16x64xf32>
    %16 = arith.mulf %10, %15 : vector<16x64xf32>
    %c0_9 = arith.constant 0 : index
    %c0_10 = arith.constant 0 : index
    %17 = vector.load %arg8[%c0_9, %c0_10] : memref<16x32xf32, #tpu.memory_space<vmem>>, vector<16x32xf32>
    %c0_11 = arith.constant 0 : index
    %c0_12 = arith.constant 0 : index
    %18 = vector.load %arg5[%c0_11, %c0_12] : memref<64x32xf32, #tpu.memory_space<vmem>>, vector<64x32xf32>
    %cst_13 = arith.constant dense<0.000000e+00> : vector<16x32xf32>
    %19 = tpu.matmul %16, %18, %cst_13 {dimension_numbers = #tpu.dot_dimension_numbers<[1], [0], [0], [1], [0, 0, 1, 1], [], []>} : vector<16x64xf32>, vector<64x32xf32>, vector<16x32xf32> -> vector<16x32xf32>
    %20 = arith.addf %17, %19 : vector<16x32xf32>
    %c0_14 = arith.constant 0 : index
    %c0_15 = arith.constant 0 : index
    %21 = vector.load %arg8[%c0_14, %c0_15] : memref<16x32xf32, #tpu.memory_space<vmem>>, vector<16x32xf32>
    tpu.vector_store %arg8[%c0_14, %c0_15], %20 {strides = array<i32>} : memref<16x32xf32, #tpu.memory_space<vmem>>, vector<16x32xf32>,
    %c0_i32_16 = arith.constant 0 : i32
    %22 = arith.cmpi eq, %arg1, %c0_i32_16 : i32
    %23 = arith.extui %22 : i1 to i32
    %c0_i32_17 = arith.constant 0 : i32
    %24 = arith.cmpi ne, %23, %c0_i32_17 : i32
    scf.if %24 {
      %c0_18 = arith.constant 0 : index
      %c0_19 = arith.constant 0 : index
      %25 = vector.load %arg8[%c0_18, %c0_19] : memref<16x32xf32, #tpu.memory_space<vmem>>, vector<16x32xf32>
      %c0_20 = arith.constant 0 : index
      %c0_21 = arith.constant 0 : index
      %26 = vector.load %arg7[%c0_20, %c0_21] : memref<16x32xf32, #tpu.memory_space<vmem>>, vector<16x32xf32>
      tpu.vector_store %arg7[%c0_20, %c0_21], %25 {strides = array<i32>} : memref<16x32xf32, #tpu.memory_space<vmem>>, vector<16x32xf32>,
    } else {
    }
    return
  }
  func.func @transform_0(%arg0: i32, %arg1: i32) -> (i32, i32) {
    %c0_i32 = arith.constant 0 : i32
    %c0_i32_0 = arith.constant 0 : i32
    return %arg0, %c0_i32 : i32, i32
  }
  func.func @transform_1(%arg0: i32, %arg1: i32) -> (i32, i32) {
    %c0_i32 = arith.constant 0 : i32
    %c0_i32_0 = arith.constant 0 : i32
    return %c0_i32, %arg1 : i32, i32
  }
  func.func @transform_2(%arg0: i32, %arg1: i32) -> (i32, i32) {
    %c0_i32 = arith.constant 0 : i32
    %c0_i32_0 = arith.constant 0 : i32
    return %c0_i32, %arg1 : i32, i32
  }
  func.func @transform_3(%arg0: i32, %arg1: i32) -> (i32, i32) {
    %c0_i32 = arith.constant 0 : i32
    %c0_i32_0 = arith.constant 0 : i32
    return %arg1, %c0_i32 : i32, i32
  }
  func.func @transform_4(%arg0: i32, %arg1: i32) -> (i32, i32) {
    %c0_i32 = arith.constant 0 : i32
    %c0_i32_0 = arith.constant 0 : i32
    %c0_i32_1 = arith.constant 0 : i32
    return %c0_i32, %c0_i32_0 : i32, i32
  }
  func.func @transform_5(%arg0: i32, %arg1: i32) -> (i32, i32) {
    %c0_i32 = arith.constant 0 : i32
    %c0_i32_0 = arith.constant 0 : i32
    return %arg0, %c0_i32 : i32, i32
  }
}

</mosaic_0001>

<bundles_post_ra>
// kernel: tpu_custom_call.1
= control target key start
LH: loop header
LB: loop body
LE: loop exit
PB: predicated region body
PF: predicated region fallthrough
CT: control target
= control target key end

     0   :  { %s416_s0 = inlined_call_operand.vmem [shape: f32[16,32], index: 0, kind: input, shape index: {}]   ;;  %s417_s1 = inlined_call_operand.vmem [shape: f32[32,64], index: 1, kind: input, shape index: {}]   ;;  %s418_s2 = inlined_call_operand.vmem [shape: f32[1,64], index: 2, kind: input, shape index: {}]   ;;  %s419_s3 = inlined_call_operand.vmem [shape: f32[64,32], index: 3, kind: input, shape index: {}]   ;;  %s420_s4 = inlined_call_operand.vmem [shape: f32[1,32], index: 4, kind: input, shape index: {}]   ;;  %s421_s5 = inlined_call_operand.hbm [shape: f32[16,32], index: 5, kind: output, shape index: {}]  }
   0x1   :  { %v37_v0 = vld [vmem:[%s417_s1 + $0x18] sm:$0xff]  ;;  %v36_v1 = vld [vmem:[%s417_s1 + $0x10] sm:$0xff]  ;;  %v35_v2 = vld [vmem:[%s417_s1 + $0x8] sm:$0xff] }
   0x2   :  { %61 = vmatpush.msra.mxu0 %v37_v0  ;;  %235 = vmatpush.msra.mxu3 %v37_v0 }
   0x4   :  { %62 = vmatpush.msra.mxu0 %v36_v1  ;;  %236 = vmatpush.msra.mxu3 %v36_v1 }
   0x5   :  { %10 = vsyncpa [#allocation4], 0  ;;  %v34_v3 = vld [vmem:[%s417_s1] sm:$0xff]  ;;  %vm29_vm0 = vcmask 261120   ;;  %v33_v5 = vld [vmem:[%s416_s0 + $0x8] sm:$0xff]  ;;  %vm170_vm9 = vcmask 523264  }
   0x6   :  { %63 = vmatpush.msra.mxu0 %v35_v2  ;;  %237 = vmatpush.msra.mxu3 %v35_v2  ;;  %v32_v4 = vld [vmem:[%s416_s0] sm:$0xff]  ;;  %v169_v14 = vld [vmem:[%s419_s3 + $0x38] sm:$0xff]  ;;  %v168_v18 = vld [vmem:[%s419_s3 + $0x30] sm:$0xff]  ;;  %s217_s24 = sshll.u32 %s421_s5, 4  ;;  %s283_s25 = smov 128   ;;  %s218_s24 = int_to_ptr.hbm [resolvable:$true] %s217_s24 }
   0x7   :  { %v250_v6 = vld [vmem:[%s418_s2] ss:$0 sm:$0xff]  ;;  %185 = vmatpush.msra.mxu1 %v169_v14  ;;  %239 = vmatpush.msra.mxu2 %v169_v14  ;;  %v167_v22 = vld [vmem:[%s419_s3 + $0x28] sm:$0xff]  ;;  %v165_v31 = vld [vmem:[%s419_s3 + $0x18] sm:$0xff]  ;;  %s284_s26 = smov 8  }
   0x8   :  { %64 = vmatpush.msra.mxu0 %v34_v3  ;;  %238 = vmatpush.msra.mxu3 %v34_v3  ;;  %v166_v26 = vld [vmem:[%s419_s3 + $0x20] sm:$0xff]  ;;  %v164_v35 = vld [vmem:[%s419_s3 + $0x10] sm:$0xff]  ;;  %v163_v40 = vld [vmem:[%s419_s3 + $0x8] sm:$0xff] }
   0x9   :  { %229 = vmatmul.msk.f32.vlgmr.msra.gmra.mxu0 %vm29_vm0, %v32_v4  ;;  %230 = vmatmul.msk.f32.vlgmr.msra.gmra.mxu3 %vm29_vm0, %v33_v5  ;;  %v162_v42 = vld [vmem:[%s419_s3] sm:$0xff] }
   0xa   :  { %186 = vmatpush.msra.mxu1 %v168_v18  ;;  %240 = vmatpush.msra.mxu2 %v168_v18  ;;  %v251_v54 = vld [vmem:[%s420_s4] ss:$0 sm:$0xff]  ;;  %s282_s4 = smov [#allocation3]  }
   0xb   :  { %30 = vst.msk [vmem:[#allocation2] sm:$0xff] %vm29_vm0, %v251_v54  ;;  %s215_s21 = sshll.u32 %s282_s4, 4  ;;  %s216_s21 = int_to_ptr.vmem [resolvable:$true] %s215_s21 }
   0xc   :  { %187 = vmatpush.msra.mxu1 %v167_v22  ;;  %241 = vmatpush.msra.mxu2 %v167_v22  ;;  %31 = vst.msk [vmem:[#allocation2 + $0x8] sm:$0xff] %vm29_vm0, %v251_v54 }
   0xe   :  { %188 = vmatpush.msra.mxu1 %v166_v26  ;;  %242 = vmatpush.msra.mxu2 %v166_v26 }
  0x10   :  { %189 = vmatpush.msra.mxu1 %v165_v31  ;;  %243 = vmatpush.msra.mxu2 %v165_v31 }
  0x12   :  { %190 = vmatpush.msra.mxu1 %v164_v35  ;;  %244 = vmatpush.msra.mxu2 %v164_v35 }
  0x14   :  { %191 = vmatpush.msra.mxu1 %v163_v40  ;;  %245 = vmatpush.msra.mxu2 %v163_v40 }
  0x16   :  { %192 = vmatpush.msra.mxu1 %v162_v42  ;;  %246 = vmatpush.msra.mxu2 %v162_v42 }
  0x86   :  { %v66_v7 = vpop.f32.mrf.mxu0 }
  0x87   :  { %v338_v8 = vadd.f32 %v250_v6, %v66_v7 }
  0x89   :  { %v341_v9 = vmul.f32 0.70710677, %v338_v8 }
  0x8b   :  { %v76_v10 = vmul.f32 %v341_v9, %v341_v9 }
  0x8c   :  { %v69_v11 = vpop.f32.mrf.mxu3 }
  0x8d   :  { %v345_v12 = vmin.f32 %v76_v10, 16.0  ;;  %v347_v13 = vadd.f32 %v250_v6, %v69_v11 }
  0x8f   :  { %v78_v15 = vmul.f32 2.1237322e-06, %v345_v12  ;;  %v89_v16 = vmul.f32 3.8918573e-05, %v345_v12  ;;  %v355_v17 = vmul.f32 0.70710677, %v347_v13 }
  0x91   :  { %v79_v19 = vadd.f32 0.00028619796, %v78_v15  ;;  %v90_v20 = vadd.f32 0.001143296, %v89_v16  ;;  %v116_v21 = vmul.f32 %v355_v17, %v355_v17 }
  0x93   :  { %v80_v23 = vmul.f32 %v79_v19, %v345_v12  ;;  %v91_v24 = vmul.f32 %v90_v20, %v345_v12  ;;  %v367_v25 = vmin.f32 %v116_v21, 16.0 }
  0x95   :  { %v81_v27 = vadd.f32 0.0036580483, %v80_v23  ;;  %v92_v28 = vadd.f32 0.014752088, %v91_v24  ;;  %v118_v29 = vmul.f32 2.1237322e-06, %v367_v25 }
  0x96   :  { %v129_v30 = vmul.f32 3.8918573e-05, %v367_v25 }
  0x97   :  { %v93_v32 = vmul.f32 %v92_v28, %v345_v12  ;;  %v119_v33 = vadd.f32 0.00028619796, %v118_v29  ;;  %v82_v37 = vmul.f32 %v81_v27, %v345_v12  ;;  %v72_v27 = vmul.f32 0.5, %v338_v8 }
  0x98   :  { %v130_v34 = vadd.f32 0.001143296, %v129_v30 }
  0x99   :  { %v94_v36 = vadd.f32 0.112945676, %v93_v32  ;;  %v120_v38 = vmul.f32 %v119_v33, %v367_v25  ;;  %v83_v46 = vadd.f32 0.05243302, %v82_v37  ;;  %v160_v37 = vld [vmem:[#allocation2] sm:$0xff] }
  0x9a   :  { %v131_v39 = vmul.f32 %v130_v34, %v367_v25  ;;  %v73_v34 = vmul.f32 0.5, %v347_v13 }
  0x9b   :  { %v95_v41 = vmul.f32 %v94_v36, %v345_v12  ;;  %v121_v45 = vadd.f32 0.0036580483, %v120_v38  ;;  %v84_v52 = vmul.f32 %v83_v46, %v345_v12 }
  0x9c   :  { %v132_v43 = vadd.f32 0.014752088, %v131_v39 }
  0x9d   :  { %v96_v44 = vadd.f32 0.4994258, %v95_v41  ;;  %v122_v51 = vmul.f32 %v121_v45, %v367_v25  ;;  %v85_v57 = vadd.f32 0.18741608, %v84_v52 }
  0x9e   :  { %v133_v47 = vmul.f32 %v132_v43, %v367_v25 }
  0x9f   :  { %v97_v48 = vmul.f32 %v96_v44, %v345_v12  ;;  %v123_v56 = vadd.f32 0.05243302, %v122_v51  ;;  %v86_v62 = vmul.f32 %v85_v57, %v345_v12 }
  0xa0   :  { %v134_v49 = vadd.f32 0.112945676, %v133_v47 }
  0xa1   :  { %v98_v50 = vadd.f32 1.0, %v97_v48  ;;  %v124_v61 = vmul.f32 %v123_v56, %v367_v25  ;;  %v87_v3 = vadd.f32 1.1283791, %v86_v62 }
  0xa2   :  { %v135_v53 = vmul.f32 %v134_v49, %v367_v25 }
  0xa3   :  { %252 = vrcp.f32 %v98_v50  ;;  %v110_v1 = vand.u32 2147483648, %v98_v50  ;;  %v125_v2 = vadd.f32 0.18741608, %v124_v61  ;;  %v108_v5 = vand.u32 2147483647, %v98_v50 }
  0xa4   :  { %v136_v55 = vadd.f32 0.4994258, %v135_v53  ;;  %vm104_vm2 = vweird.f32 %v98_v50  ;;  %v88_v15 = vmul.f32 %v87_v3, %v341_v9 }
  0xa5   :  { %v111_v10 = vor.u32 1.1754944e-38, %v110_v1  ;;  %v126_v11 = vmul.f32 %v125_v2, %v367_v25  ;;  %vm109_vm4 = vcmp.eq.f32.partialorder %v108_v5, 8.507059e+37 }
  0xa6   :  { %v137_v58 = vmul.f32 %v136_v55, %v367_v25 }
  0xa7   :  { %v127_v21 = vadd.f32 1.1283791, %v126_v11 }
  0xa8   :  { %v138_v59 = vadd.f32 1.0, %v137_v58 }
  0xa9   :  { %v253_v60 = vpop.eup %252  ;;  %v128_v9 = vmul.f32 %v127_v21, %v355_v17  ;;  %v161_v17 = vld [vmem:[#allocation2 + $0x8] sm:$0xff] }
  0xaa   :  { %v100_v63 = vmul.f32 %v253_v60, %v98_v50  ;;  %254 = vrcp.f32 %v138_v59  ;;  %vm105_vm1 = vweird.f32 %v253_v60  ;;  %v150_v20 = vand.u32 2147483648, %v138_v59 }
  0xab   :  { %vm106_vm3 = vmor %vm104_vm2, %vm105_vm1  ;;  %v148_v23 = vand.u32 2147483647, %v138_v59  ;;  %vm144_vm6 = vweird.f32 %v138_v59 }
  0xac   :  { %v101_v0 = vsub.f32 1.0, %v100_v63  ;;  %v151_v25 = vor.u32 1.1754944e-38, %v150_v20 }
  0xad   :  { %vm149_vm8 = vcmp.eq.f32.partialorder %v148_v23, 8.507059e+37 }
  0xae   :  { %v102_v4 = vmul.f32 %v253_v60, %v101_v0 }
  0xb0   :  { %v255_v6 = vpop.eup %254  ;;  %v103_v7 = vadd.f32 %v253_v60, %v102_v4 }
  0xb1   :  { %v140_v14 = vmul.f32 %v255_v6, %v138_v59  ;;  %vm145_vm5 = vweird.f32 %v255_v6 }
  0xb2   :  { %v107_v12 = vsel %vm106_vm3, %v253_v60, %v103_v7  ;;  %vm146_vm7 = vmor %vm144_vm6, %vm145_vm5 }
  0xb3   :  { %v112_v16 = vsel %vm109_vm4, %v111_v10, %v107_v12  ;;  %v141_v18 = vsub.f32 1.0, %v140_v14 }
  0xb4   :  { %v113_v19 = vmul.f32 %v112_v16, %v88_v15 }
  0xb5   :  { %v142_v22 = vmul.f32 %v255_v6, %v141_v18 }
  0xb6   :  { %v231_v24 = vclamps-f32 %v113_v19, 1.0 }
  0xb7   :  { %v143_v26 = vadd.f32 %v255_v6, %v142_v22 }
  0xb8   :  { %v156_v28 = vadd.f32 1.0, %v231_v24 }
  0xb9   :  { %v147_v29 = vsel %vm146_vm7, %v255_v6, %v143_v26 }
  0xba   :  { %v152_v30 = vsel %vm149_vm8, %v151_v25, %v147_v29  ;;  %v158_v31 = vmul.f32 %v156_v28, %v72_v27 }
  0xbb   :  { %v153_v32 = vmul.f32 %v152_v30, %v128_v9 }
  0xbc   :  { %233 = vmatmul.msk.f32.vlgmr.msra.gmra.mxu1 %vm170_vm9, %v158_v31 }
  0xbd   :  { %v232_v33 = vclamps-f32 %v153_v32, 1.0 }
  0xbf   :  { %v157_v35 = vadd.f32 1.0, %v232_v33 }
  0xc1   :  { %v159_v36 = vmul.f32 %v157_v35, %v73_v34 }
  0xc3   :  { %234 = vmatmul.msk.f32.vlgmr.msra.gmra.mxu2 %vm170_vm9, %v159_v36 }
 0x139   :  { %v194_v8 = vpop.f32.mrf.mxu1 }
 0x13a   :  { %v200_v38 = vadd.f32 %v194_v8, %v160_v37 }
 0x13c   :  { %202 = vst.msk [vmem:[#allocation2] sm:$0xff] %vm29_vm0, %v200_v38 }
 0x143   :  { %v207_v39 = vld [vmem:[#allocation2] sm:$0xff] }
 0x144   :  { %209 = vst.msk [vmem:[#allocation3] sm:$0xff] %vm29_vm0, %v207_v39 }
 0x146   :  { %v197_v40 = vpop.f32.mrf.mxu2 }
 0x147   :  { %v201_v41 = vadd.f32 %v197_v40, %v161_v17 }
 0x149   :  { %203 = vst.msk [vmem:[#allocation2 + $0x8] sm:$0xff] %vm29_vm0, %v201_v41 }
 0x150   :  { %v208_v13 = vld [vmem:[#allocation2 + $0x8] sm:$0xff] }
 0x151   :  { %210 = vst.msk [vmem:[#allocation3 + $0x8] sm:$0xff] %vm29_vm0, %v208_v13 }
 0x152   :  { %223 = dma.vmem_to_hbm [thread:$0]  %s216_s21, 256, %s218_s24, [#allocation4], %s283_s25, %s283_s25, %s284_s26  }
 0x153   :  { %280 = dma.done.wait [#allocation4], 256  }
 0x154   :  { %281 = vsyncadd [#allocation4], 4294967040 }
 0x155   :  { %228 = vsyncpa [#allocation4], 1 }

</bundles_post_ra>
